<compile_context>
chip_gen: v7x
topology: tpu7x:2x2x1
jax: 0.10.0
libtpu: 0.0.40
codegen_flags: <defaults>
</compile_context>

<pallas_src>
import functools

import jax
import jax.numpy as jnp
from jax.experimental import pallas as pl
from jax.experimental.pallas import tpu as pltpu

LANES = 128  # vreg lane width


def _tpu_config():
    """(num_tensorcores_to_use, max_row_tile) tuned per TPU generation."""
    kind = ""
    try:
        kind = jax.devices()[0].device_kind.lower()
    except Exception:
        pass
    if "v7" in kind or "7x" in kind:
        # 2 TensorCores/chip, ~1.6 TB/s per TC: split the reduction and use a
        # 1 MiB (2048, 128) f32 block to amortize per-step pipeline overhead.
        return 2, 2048
    # v5e / v6e: single TensorCore; (1024, 128) is already near the roofline
    # and respects v5e's smaller (16 MiB) scoped-VMEM default.
    return 1, 1024


def _mse_kernel(pred_ref, truth_ref, out_ref, acc_ref, *,
                n_valid_rows, row_tile, blocks_per_core, total_blocks, ncores):
    """Accumulate sum((pred - truth)^2) into a block-shaped VMEM accumulator."""
    i = pl.program_id(0)          # core (parallel) axis
    j = pl.program_id(1)          # reduction (arbitrary) axis

    @pl.when(j == 0)
    def _():
        acc_ref[...] = jnp.zeros_like(acc_ref)

    last_blk = total_blocks - 1
    last_block_full = (n_valid_rows % row_tile) == 0            # static
    no_duplicates = (blocks_per_core * ncores) == total_blocks  # static

    def accum_full():
        # Diff in input dtype, widen for the square-accumulate (torch MSELoss
        # computes the difference in the input dtype; accumulation is f32).
        d = (pred_ref[...] - truth_ref[...]).astype(jnp.float32)
        acc_ref[...] += d * d

    def accum_masked_last():
        d = (pred_ref[...] - truth_ref[...]).astype(jnp.float32)
        rows = (jax.lax.broadcasted_iota(jnp.int32, acc_ref.shape, 0)
                + last_blk * row_tile)
        d = jnp.where(rows < n_valid_rows, d, 0.0)
        acc_ref[...] += d * d

    if last_block_full and no_duplicates:
        # Common aligned case: every block is full and valid -> branch-free,
        # pure VPU sub/mul/add steady state.
        accum_full()
    else:
        blk = i * blocks_per_core + j

        @pl.when(blk < last_blk)
        def _():
            accum_full()

        @pl.when(blk == last_blk)
        def _():
            if last_block_full:
                accum_full()
            else:
                accum_masked_last()

        # blk > last_blk: clamped duplicate block on a spare trailing step of
        # this core -> contributes nothing (accumulation skipped entirely).

    @pl.when(j == pl.num_programs(1) - 1)
    def _():
        # Single XLU reduction per core: collapse rows -> per-lane partials.
        out_ref[...] = jnp.sum(acc_ref[...], axis=0, keepdims=True)


def mse_loss(pred, truth):
    """Pallas equivalent of torch.nn.MSELoss()(pred, truth) -> scalar."""
    assert pred.shape == truth.shape, "MSELoss expects matching shapes"
    n_elems = pred.size
    if n_elems == 0:
        return jnp.float32(jnp.nan)

    p = jnp.ravel(pred)
    t = jnp.ravel(truth)

    n_main_rows = n_elems // LANES
    n_main = n_main_rows * LANES
    rem = n_elems - n_main

    # <=127 remainder elements: summed in a tiny XLA epilogue (no full-array
    # pad/copy of the kernel inputs).
    if rem:
        dt = p[n_main:].astype(jnp.float32) - t[n_main:].astype(jnp.float32)
        tail_sq = jnp.sum(dt * dt)
    else:
        tail_sq = jnp.float32(0.0)

    if n_main_rows == 0:
        # Whole array is smaller than one lane row -> nothing for the kernel.
        return tail_sq / jnp.float32(n_elems)

    if rem:
        p = p[:n_main]
        t = t[:n_main]
    p2 = p.reshape(n_main_rows, LANES)
    t2 = t.reshape(n_main_rows, LANES)

    ncores_hw, max_row_tile = _tpu_config()
    row_tile = min(max_row_tile, n_main_rows)
    total_blocks = pl.cdiv(n_main_rows, row_tile)
    ncores = ncores_hw if total_blocks >= ncores_hw else 1
    blocks_per_core = pl.cdiv(total_blocks, ncores)

    def in_map(i, j):
        # Clamp so a spare trailing step never maps past the array; the
        # kernel skips accumulation for that duplicated block.
        return (jnp.minimum(i * blocks_per_core + j, total_blocks - 1), 0)

    itemsize = jnp.dtype(pred.dtype).itemsize
    cost = pl.CostEstimate(
        flops=3 * n_main,
        transcendentals=0,
        bytes_accessed=2 * n_main * itemsize + ncores * LANES * 4,
    )

    partials = pl.pallas_call(
        functools.partial(
            _mse_kernel,
            n_valid_rows=n_main_rows,
            row_tile=row_tile,
            blocks_per_core=blocks_per_core,
            total_blocks=total_blocks,
            ncores=ncores,
        ),
        out_shape=jax.ShapeDtypeStruct((ncores, LANES), jnp.float32),
        grid=(ncores, blocks_per_core),
        in_specs=[
            pl.BlockSpec((row_tile, LANES), in_map),
            pl.BlockSpec((row_tile, LANES), in_map),
        ],
        out_specs=pl.BlockSpec((1, LANES), lambda i, j: (i, 0)),
        scratch_shapes=[pltpu.VMEM((row_tile, LANES), jnp.float32)],
        compiler_params=pltpu.CompilerParams(
            dimension_semantics=("parallel", "arbitrary")),
        cost_estimate=cost,
    )(p2, t2)

    # Tiny epilogue in XLA: sum the per-lane partials, add the ragged tail and
    # divide by the true element count.
    return (jnp.sum(partials) + tail_sq) / jnp.float32(n_elems)


if __name__ == "__main__":
    key = jax.random.PRNGKey(0)
    k1, k2, k3, k4, k5, k6, k7, k8 = jax.random.split(key, 8)

    # Primary check: small NCHW prediction/target pair, per the module spec.
    pred = jax.random.normal(k1, (2, 4, 16, 16), dtype=jnp.float32)
    truth = jax.random.normal(k2, (2, 4, 16, 16), dtype=jnp.float32)
    loss = jax.block_until_ready(mse_loss(pred, truth))
    ref = jnp.mean((pred - truth) ** 2)
    assert jnp.allclose(loss, ref, rtol=1e-5, atol=1e-5), (loss, ref)

    # Tiny ragged check: fewer than 128 elements (pure-epilogue path).
    pred_r = jax.random.normal(k3, (3, 5, 7), dtype=jnp.float32)
    truth_r = jax.random.normal(k4, (3, 5, 7), dtype=jnp.float32)
    loss_r = jax.block_until_ready(mse_loss(pred_r, truth_r))
    ref_r = jnp.mean((pred_r - truth_r) ** 2)
    assert jnp.allclose(loss_r, ref_r, rtol=1e-5, atol=1e-5), (loss_r, ref_r)

    # Ragged check with both a kernel part and a <128-element tail.
    pred_g = jax.random.normal(k5, (3, 50, 7), dtype=jnp.float32)
    truth_g = jax.random.normal(k6, (3, 50, 7), dtype=jnp.float32)
    loss_g = jax.block_until_ready(mse_loss(pred_g, truth_g))
    ref_g = jnp.mean((pred_g - truth_g) ** 2)
    assert jnp.allclose(loss_g, ref_g, rtol=1e-5, atol=1e-5), (loss_g, ref_g)

    # Multi-block check: exercises the reduction loop and the in-kernel mask
    # of the partial last block (1040 rows -> two (1024,128) blocks on v5e/v6e).
    pred_b = jax.random.normal(k7, (2, 4, 128, 130), dtype=jnp.float32)
    truth_b = jax.random.normal(k8, (2, 4, 128, 130), dtype=jnp.float32)
    loss_b = jax.block_until_ready(mse_loss(pred_b, truth_b))
    ref_b = jnp.mean((pred_b - truth_b) ** 2)
    assert jnp.allclose(loss_b, ref_b, rtol=1e-4, atol=1e-5), (loss_b, ref_b)

    print("KERNEL_OK")
</pallas_src>

<mosaic_0001>
module attributes {stable_mosaic.version = 11 : i64} {
  func.func @_mse_kernel(%arg0: i32, %arg1: i32, %arg2: memref<16x128xf32, #tpu.memory_space<vmem>>, %arg3: memref<16x128xf32, #tpu.memory_space<vmem>>, %arg4: memref<1x128xf32, #tpu.memory_space<vmem>>, %arg5: memref<16x128xf32, #tpu.memory_space<vmem>>) attributes {dimension_semantics = [#tpu.dimension_semantics<parallel>, #tpu.dimension_semantics<arbitrary>], iteration_bounds = array<i64: 1, 1>, scalar_prefetch = 0 : i64, scratch_operands = 1 : i64, tpu.core_type = #tpu.core_type<tc>, window_params = [{transform_indices = @transform_0, window_bounds = array<i64: 16, 128>}, {transform_indices = @transform_1, window_bounds = array<i64: 16, 128>}, {transform_indices = @transform_2, window_bounds = array<i64: 1, 128>}]} {
    %c0_i32 = arith.constant 0 : i32
    %0 = arith.cmpi eq, %arg1, %c0_i32 : i32
    %1 = arith.extui %0 : i1 to i32
    %c0_i32_0 = arith.constant 0 : i32
    %2 = arith.cmpi ne, %1, %c0_i32_0 : i32
    scf.if %2 {
      %cst = arith.constant 0.000000e+00 : f32
      %13 = vector.broadcast %cst : f32 to vector<16x128xf32>
      %c0_10 = arith.constant 0 : index
      %c0_11 = arith.constant 0 : index
      %14 = vector.load %arg5[%c0_10, %c0_11] : memref<16x128xf32, #tpu.memory_space<vmem>>, vector<16x128xf32>
      tpu.vector_store %arg5[%c0_10, %c0_11], %13 {strides = array<i32>} : memref<16x128xf32, #tpu.memory_space<vmem>>, vector<16x128xf32>,
    } else {
    }
    %c0 = arith.constant 0 : index
    %c0_1 = arith.constant 0 : index
    %3 = vector.load %arg2[%c0, %c0_1] : memref<16x128xf32, #tpu.memory_space<vmem>>, vector<16x128xf32>
    %c0_2 = arith.constant 0 : index
    %c0_3 = arith.constant 0 : index
    %4 = vector.load %arg3[%c0_2, %c0_3] : memref<16x128xf32, #tpu.memory_space<vmem>>, vector<16x128xf32>
    %5 = arith.subf %3, %4 : vector<16x128xf32>
    %c0_4 = arith.constant 0 : index
    %c0_5 = arith.constant 0 : index
    %6 = vector.load %arg5[%c0_4, %c0_5] : memref<16x128xf32, #tpu.memory_space<vmem>>, vector<16x128xf32>
    %7 = arith.mulf %5, %5 : vector<16x128xf32>
    %8 = arith.addf %6, %7 : vector<16x128xf32>
    %c0_6 = arith.constant 0 : index
    %c0_7 = arith.constant 0 : index
    %9 = vector.load %arg5[%c0_6, %c0_7] : memref<16x128xf32, #tpu.memory_space<vmem>>, vector<16x128xf32>
    tpu.vector_store %arg5[%c0_6, %c0_7], %8 {strides = array<i32>} : memref<16x128xf32, #tpu.memory_space<vmem>>, vector<16x128xf32>,
    %c0_i32_8 = arith.constant 0 : i32
    %10 = arith.cmpi eq, %arg1, %c0_i32_8 : i32
    %11 = arith.extui %10 : i1 to i32
    %c0_i32_9 = arith.constant 0 : i32
    %12 = arith.cmpi ne, %11, %c0_i32_9 : i32
    scf.if %12 {
      %c0_10 = arith.constant 0 : index
      %c0_11 = arith.constant 0 : index
      %13 = vector.load %arg5[%c0_10, %c0_11] : memref<16x128xf32, #tpu.memory_space<vmem>>, vector<16x128xf32>
      %cst = arith.constant dense<0.000000e+00> : vector<128xf32>
      %14 = vector.multi_reduction <add>, %13, %cst [0] : vector<16x128xf32> to vector<128xf32>
      %15 = vector.shape_cast %14 : vector<128xf32> to vector<1x128xf32>
      %c0_12 = arith.constant 0 : index
      %c0_13 = arith.constant 0 : index
      %16 = vector.load %arg4[%c0_12, %c0_13] : memref<1x128xf32, #tpu.memory_space<vmem>>, vector<1x128xf32>
      tpu.vector_store %arg4[%c0_12, %c0_13], %15 {strides = array<i32>} : memref<1x128xf32, #tpu.memory_space<vmem>>, vector<1x128xf32>,
    } else {
    }
    return
  }
  func.func @transform_0(%arg0: i32, %arg1: i32) -> (i32, i32) {
    %c1_i32 = arith.constant 1 : i32
    %0 = arith.muli %arg0, %c1_i32 : i32
    %1 = arith.addi %0, %arg1 : i32
    %c0_i32 = arith.constant 0 : i32
    %2 = arith.minsi %1, %c0_i32 : i32
    %c0_i32_0 = arith.constant 0 : i32
    %c0_i32_1 = arith.constant 0 : i32
    return %2, %c0_i32_0 : i32, i32
  }
  func.func @transform_1(%arg0: i32, %arg1: i32) -> (i32, i32) {
    %c1_i32 = arith.constant 1 : i32
    %0 = arith.muli %arg0, %c1_i32 : i32
    %1 = arith.addi %0, %arg1 : i32
    %c0_i32 = arith.constant 0 : i32
    %2 = arith.minsi %1, %c0_i32 : i32
    %c0_i32_0 = arith.constant 0 : i32
    %c0_i32_1 = arith.constant 0 : i32
    return %2, %c0_i32_0 : i32, i32
  }
  func.func @transform_2(%arg0: i32, %arg1: i32) -> (i32, i32) {
    %c0_i32 = arith.constant 0 : i32
    %c0_i32_0 = arith.constant 0 : i32
    return %arg0, %c0_i32 : i32, i32
  }
}

</mosaic_0001>

<bundles_post_ra>
// kernel: tpu_custom_call.1
= control target key start
LH: loop header
LB: loop body
LE: loop exit
PB: predicated region body
PF: predicated region fallthrough
CT: control target
= control target key end

     0   :  { %7 = vsyncpa [#allocation4], 0  ;;  %s246_s0 = inlined_call_operand.hbm [shape: f32[16,128], index: 0, kind: input, shape index: {}]   ;;  %s247_s1 = inlined_call_operand.hbm [shape: f32[16,128], index: 1, kind: input, shape index: {}]   ;;  %s248_s2 = inlined_call_operand.hbm [shape: f32[1,128], index: 2, kind: output, shape index: {}]  }
   0x1   :  { %8 = vsyncpa [#allocation7], 0 }
   0x2   :  { %9 = vsyncpa [#allocation5], 0  ;;  %s190_s9 = smov [#allocation3]   ;;  %s118_s13 = scalar_lea.hbm %s246_s0, 256 }
   0x3   :  { %s21_s10 = sshll.u32 %s190_s9, 4  ;;  %p119_p0 = scmp.ne.s32.totalorder %s246_s0, %s118_s13  ;;  %s22_s10 = int_to_ptr.vmem [resolvable:$true] %s21_s10 }
   0x4   :  { %p122_p1 = scmp.lt.u32.totalorder %s118_s13, %s246_s0 }
   0x6   :  { %p124_p2 = pnand %p122_p1, %p119_p0 }
   0x8   :  { %127 = shalt.err (!%p124_p2)
}
   0x9   :  { %s128_s18 = scalar_lea.vmem %s22_s10, 256  ;;  %p133_p4 = scmp.lt.s32.totalorder %s22_s10, %s22_s10 }
   0xa   :  { %p129_p3 = scmp.ne.s32.totalorder %s22_s10, %s128_s18  ;;  %p134_p5 = scmp.lt.s32.totalorder %s128_s18, %s128_s18 }
   0xc   :  { %p135_p6 = por %p134_p5, %p133_p4 }
   0xe   :  { %p136_p7 = pnand %p135_p6, %p129_p3 }
  0x10   :  { %139 = shalt.err (!%p136_p7)
}
  0x11   :  { %s191_s19 = smov 128   ;;  %s192_s20 = smov 8  }
  0x12   :  { %27 = dma.hbm_to_vmem [thread:$0]  %s246_s0, 256, %s22_s10, [#allocation4], %s191_s19, %s191_s19, %s192_s20  }
  0x13   :  { %s193_s23 = smov [#allocation6]   ;;  %s140_s27 = scalar_lea.hbm %s247_s1, 256 }
  0x14   :  { %s39_s24 = sshll.u32 %s193_s23, 4  ;;  %p141_p8 = scmp.ne.s32.totalorder %s247_s1, %s140_s27  ;;  %s40_s24 = int_to_ptr.vmem [resolvable:$true] %s39_s24 }
  0x15   :  { %p144_p9 = scmp.lt.u32.totalorder %s140_s27, %s247_s1 }
  0x17   :  { %p146_p10 = pnand %p144_p9, %p141_p8 }
  0x19   :  { %149 = shalt.err (!%p146_p10)
}
  0x1a   :  { %s150_s4 = scalar_lea.vmem %s40_s24, 256  ;;  %p155_p12 = scmp.lt.s32.totalorder %s40_s24, %s40_s24 }
  0x1b   :  { %p151_p11 = scmp.ne.s32.totalorder %s40_s24, %s150_s4  ;;  %p156_p13 = scmp.lt.s32.totalorder %s150_s4, %s150_s4 }
  0x1d   :  { %p157_p0 = por %p156_p13, %p155_p12 }
  0x1f   :  { %p158_p1 = pnand %p157_p0, %p151_p11 }
  0x21   :  { %161 = shalt.err (!%p158_p1)
}
  0x22   :  { %45 = dma.hbm_to_vmem [thread:$0]  %s247_s1, 256, %s40_s24, [#allocation7], %s191_s19, %s191_s19, %s192_s20  }
  0x23   :  { %184 = dma.done.wait [#allocation4], 256  }
  0x24   :  { %185 = vsyncadd [#allocation4], 4294967040 }
  0x25   :  { %186 = dma.done.wait [#allocation7], 256  }
  0x26   :  { %187 = vsyncadd [#allocation7], 4294967040  ;;  %v66_v0 = vld [vmem:[#allocation3] sm:$0xff]  ;;  %v67_v1 = vld [vmem:[#allocation3 + $0x8] sm:$0xff]  ;;  %s194_s6 = smov [#allocation8]  }
  0x27   :  { %v68_v2 = vld [vmem:[#allocation6] sm:$0xff]  ;;  %v69_v3 = vld [vmem:[#allocation6 + $0x8] sm:$0xff]  ;;  %s99_s7 = sshll.u32 %s194_s6, 4  ;;  %s100_s7 = int_to_ptr.vmem [resolvable:$true] %s99_s7 }
  0x28   :  { %v70_v4 = vsub.f32 %v66_v0, %v68_v2  ;;  %v71_v5 = vsub.f32 %v67_v1, %v69_v3  ;;  %s162_s1 = scalar_lea.vmem %s100_s7, 16  ;;  %s166_s8 = scalar_lea.vmem %s100_s7, 32 }
  0x29   :  { %p163_p2 = scmp.ne.s32.totalorder %s100_s7, %s162_s1  ;;  %p167_p3 = scmp.lt.s32.totalorder %s100_s7, %s100_s7 }
  0x2a   :  { %v74_v6 = vmul.f32 %v70_v4, %v70_v4  ;;  %v75_v7 = vmul.f32 %v71_v5, %v71_v5  ;;  %p168_p4 = scmp.lt.s32.totalorder %s166_s8, %s162_s1 }
  0x2c   :  { %v85_v8 = vadd.f32 %v75_v7, %v74_v6  ;;  %p169_p5 = por %p168_p4, %p167_p3 }
  0x2e   :  { %v86_v9 = vrot.slane %v85_v8, 4  ;;  %p170_p6 = pnand %p169_p5, %p163_p2 }
  0x30   :  { %v87_v10 = vadd.f32 %v86_v9, %v85_v8 }
  0x32   :  { %v88_v11 = vrot.slane %v87_v10, 2 }
  0x34   :  { %v89_v12 = vadd.f32 %v88_v11, %v87_v10 }
  0x36   :  { %v90_v13 = vrot.slane %v89_v12, 1 }
  0x38   :  { %v91_v14 = vadd.f32 %v90_v13, %v89_v12 }
  0x3a   :  { %92 = vst [vmem:[#allocation8] sm:$0x1] %v91_v14 }
  0x3b   :  { %173 = shalt.err (!%p170_p6)
}
  0x3c   :  { %s174_s11 = scalar_lea.hbm %s248_s2, 16 }
  0x3d   :  { %p175_p7 = scmp.ne.s32.totalorder %s248_s2, %s174_s11  ;;  %p178_p8 = scmp.lt.u32.totalorder %s174_s11, %s248_s2 }
  0x3f   :  { %p180_p9 = pnand %p178_p8, %p175_p7 }
  0x41   :  { %183 = shalt.err (!%p180_p9)
}
  0x42   :  { %102 = dma.vmem_to_hbm [thread:$0]  %s100_s7, 16, %s248_s2, [#allocation5]  }
  0x43   :  { %188 = dma.done.wait [#allocation5], 16  }
  0x44   :  { %189 = vsyncadd [#allocation5], 4294967280 }
  0x45   :  { %106 = vsyncpa [#allocation4], 1 }
  0x46   :  { %107 = vsyncpa [#allocation7], 1 }
  0x47   :  { %108 = vsyncpa [#allocation5], 1 }

</bundles_post_ra>
